<compile_context>
chip_gen: v7x
topology: tpu7x:2x2x1
jax: 0.10.0
libtpu: 0.0.40
codegen_flags: <defaults>
</compile_context>

<pallas_src>
import functools

import jax
import jax.numpy as jnp
from jax.experimental import pallas as pl
from jax.experimental.pallas import tpu as pltpu

BN_EPS = 1e-5
LANE = 128
SUBLANE = 8


def _round_up(v, m):
    return ((v + m - 1) // m) * m


def _pad_to(a, rows, cols):
    r, c = a.shape
    return jnp.pad(a, ((0, rows - r), (0, cols - c)))


# ----------------------------------------------------------------------------
# Single fused kernel: encoders -> n_layers x (GINEConv + ReLU) -> pool -> fc
# ----------------------------------------------------------------------------
def gin_fused_kernel(
    x_ref, ea_ref, src_ref, dst_ref, batch_ref,
    nw_ref, nb_ref, ew_ref, eb_ref,
    w1s_ref, b1s_ref, w2s_ref, b2s_ref,
    ow_ref, ob_ref,
    o_ref,
    *, n_layers, num_graphs_p,
):
    f32 = jnp.float32
    bf16 = jnp.bfloat16

    N = x_ref.shape[0]          # padded node count
    E = ea_ref.shape[0]         # padded edge count
    G = num_graphs_p            # padded graph count

    # node / edge encoders: bf16 operands into MXU, f32 accumulate, f32 bias add
    h = jnp.dot(x_ref[...].astype(bf16), nw_ref[...],
                preferred_element_type=f32) + nb_ref[...]
    ea = jnp.dot(ea_ref[...].astype(bf16), ew_ref[...],
                 preferred_element_type=f32) + eb_ref[...]

    # Build one-hot gather / scatter / pool matrices in VMEM from index vectors.
    # Padded entries use index -1 -> all-zero row/column -> no contribution.
    # Orientations are chosen so every contraction is a plain jnp.dot.
    lane_n = jax.lax.broadcasted_iota(jnp.int32, (E, N), 1)        # node id along lanes
    a_src = jnp.where(src_ref[...] == lane_n, 1.0, 0.0).astype(bf16)   # [E, N]
    row_n = jax.lax.broadcasted_iota(jnp.int32, (N, E), 0)         # node id along sublanes
    a_dst_t = jnp.where(dst_ref[...] == row_n, 1.0, 0.0).astype(bf16)  # [N, E]
    row_g = jax.lax.broadcasted_iota(jnp.int32, (G, N), 0)         # graph id along sublanes
    pool_t = jnp.where(batch_ref[...] == row_g, 1.0, 0.0).astype(bf16)  # [G, N]

    # TODO(synk): for non-toy graphs, replace the dense one-hot matmuls with
    # index-based gather / blocked segment-sum (scalar-prefetched src/dst in
    # SMEM), add a tiled grid over node/edge blocks with "parallel"
    # dimension_semantics (2 TCs on v7x) and an explicit vmem_limit_bytes.
    for l in range(n_layers):  # static unroll (n_layers is tiny)
        # gather x_j for every edge: [E,N] @ [N,H] -> [E,H]    (bf16 in / f32 acc)
        xj = jnp.dot(a_src, h.astype(bf16), preferred_element_type=f32)
        # GINEConv message: relu(x_j + edge_attr)               (f32 elementwise)
        msg = jnp.maximum(xj + ea, 0.0)
        # scatter-add to destination nodes: [N,E] @ [E,H] -> [N,H]
        aggr = jnp.dot(a_dst_t, msg.astype(bf16), preferred_element_type=f32)
        z = h + aggr  # (1 + eps) * x + aggr with eps = 0

        # GIN.MLP with eval-mode BatchNorm folded into the first Linear
        t = jnp.dot(z.astype(bf16), w1s_ref[l], preferred_element_type=f32) + b1s_ref[l]
        t = jnp.maximum(t, 0.0)
        t = jnp.dot(t.astype(bf16), w2s_ref[l], preferred_element_type=f32) + b2s_ref[l]
        # outer ReLU from GIN.forward; dropout is identity in eval mode
        h = jnp.maximum(t, 0.0)

    # global_add_pool: [G,N] @ [N,H] -> [G,H]
    g = jnp.dot(pool_t, h.astype(bf16), preferred_element_type=f32)
    # fc_out
    o_ref[...] = jnp.dot(g.astype(bf16), ow_ref[...],
                         preferred_element_type=f32) + ob_ref[...]


# ----------------------------------------------------------------------------
# Parameter init (unpadded f32, matches the PyTorch module's parameterization)
# ----------------------------------------------------------------------------
def init_params(key, x_dim, edge_attr_dim, hidden, n_layers, out_dim):
    keys = jax.random.split(key, 4 + 6 * n_layers)
    ki = iter(range(len(keys)))

    def lin(k_w, in_d, out_d):
        w = jax.random.normal(keys[k_w], (in_d, out_d), jnp.float32) * 0.1
        b = jnp.full((1, out_d), 0.01, jnp.float32)
        return w, b

    p = {}
    p["node_w"], p["node_b"] = lin(next(ki), x_dim, hidden)
    p["edge_w"], p["edge_b"] = lin(next(ki), edge_attr_dim, hidden)

    p["convs"] = []
    for _ in range(n_layers):
        w1, b1 = lin(next(ki), hidden, hidden)
        w2, b2 = lin(next(ki), hidden, hidden)
        gamma = 1.0 + 0.05 * jax.random.normal(keys[next(ki)], (1, hidden), jnp.float32)
        beta = 0.05 * jax.random.normal(keys[next(ki)], (1, hidden), jnp.float32)
        mean = 0.05 * jax.random.normal(keys[next(ki)], (1, hidden), jnp.float32)
        var = 1.0 + 0.1 * jnp.abs(
            jax.random.normal(keys[next(ki)], (1, hidden), jnp.float32)
        )
        p["convs"].append(
            dict(w1=w1, b1=b1, w2=w2, b2=b2,
                 bn_gamma=gamma, bn_beta=beta, bn_mean=mean, bn_var=var)
        )

    p["out_w"], p["out_b"] = lin(next(ki), hidden, out_dim)
    return p


# ----------------------------------------------------------------------------
# Host-side prep: fold eval-mode BN into w1/b1, pad K dims to 8 and lane dims
# to 128, cast weight matrices to bf16 (biases stay f32), stack per-layer
# weights so the kernel indexes them with a static layer id.
# ----------------------------------------------------------------------------
def prepare_inference_params(p, x_dim, edge_attr_dim, hidden, out_dim):
    Xp = _round_up(max(x_dim, 1), SUBLANE)       # K dim: sublane minimum only
    Ap = _round_up(max(edge_attr_dim, 1), SUBLANE)
    Hp = _round_up(hidden, LANE)                 # lane (output) dims stay 128
    Cp = _round_up(max(out_dim, 1), LANE)
    bf16 = jnp.bfloat16

    prep = {
        "node_w": _pad_to(p["node_w"], Xp, Hp).astype(bf16),
        "node_b": _pad_to(p["node_b"], 1, Hp),
        "edge_w": _pad_to(p["edge_w"], Ap, Hp).astype(bf16),
        "edge_b": _pad_to(p["edge_b"], 1, Hp),
        "out_w": _pad_to(p["out_w"], Hp, Cp).astype(bf16),
        "out_b": _pad_to(p["out_b"], 1, Cp),
    }

    w1s, b1s, w2s, b2s = [], [], [], []
    for cp in p["convs"]:
        scale = cp["bn_gamma"] * jax.lax.rsqrt(cp["bn_var"] + BN_EPS)   # [1,H]
        w1f = cp["w1"] * scale                                          # fold BN scale
        b1f = (cp["b1"] - cp["bn_mean"]) * scale + cp["bn_beta"]        # fold BN shift
        w1s.append(_pad_to(w1f, Hp, Hp))
        b1s.append(_pad_to(b1f, 1, Hp))
        w2s.append(_pad_to(cp["w2"], Hp, Hp))
        b2s.append(_pad_to(cp["b2"], 1, Hp))
    prep["w1s"] = jnp.stack(w1s).astype(bf16)   # [L, Hp, Hp] bf16
    prep["b1s"] = jnp.stack(b1s)                # [L, 1, Hp]  f32
    prep["w2s"] = jnp.stack(w2s).astype(bf16)
    prep["b2s"] = jnp.stack(b2s)
    return prep


# ----------------------------------------------------------------------------
# Forward: pads N/E/G to sublane multiples, passes raw int32 index vectors
# (one-hots are built inside the kernel), single fused pallas_call.
# ----------------------------------------------------------------------------
@functools.partial(
    jax.jit, static_argnames=("num_nodes", "num_graphs", "n_layers", "out_dim")
)
def gin_forward(prep, x, edge_index, batch, edge_attr,
                num_nodes, num_graphs, n_layers, out_dim):
    N, E = num_nodes, edge_attr.shape[0]
    Np = _round_up(N, SUBLANE)
    Ep = _round_up(E, SUBLANE)
    Gp = _round_up(num_graphs, SUBLANE)

    Xp = prep["node_w"].shape[0]
    Ap = prep["edge_w"].shape[0]
    Hp = prep["node_w"].shape[1]
    Cp = prep["out_w"].shape[1]

    x_p = jnp.pad(x.astype(jnp.float32),
                  ((0, Np - N), (0, Xp - x.shape[1])))
    ea_p = jnp.pad(edge_attr.astype(jnp.float32),
                   ((0, Ep - E), (0, Ap - edge_attr.shape[1])))
    # padded entries get index -1 -> never match any iota -> zero contribution
    src = jnp.pad(edge_index[0].astype(jnp.int32), (0, Ep - E),
                  constant_values=-1).reshape(Ep, 1)
    dst = jnp.pad(edge_index[1].astype(jnp.int32), (0, Ep - E),
                  constant_values=-1).reshape(1, Ep)
    bat = jnp.pad(batch.astype(jnp.int32), (0, Np - N),
                  constant_values=-1).reshape(1, Np)

    vmem = pl.BlockSpec(memory_space=pltpu.MemorySpace.VMEM)
    kernel = functools.partial(gin_fused_kernel, n_layers=n_layers,
                               num_graphs_p=Gp)

    operands = (
        x_p, ea_p, src, dst, bat,
        prep["node_w"], prep["node_b"], prep["edge_w"], prep["edge_b"],
        prep["w1s"], prep["b1s"], prep["w2s"], prep["b2s"],
        prep["out_w"], prep["out_b"],
    )
    flops = (
        2 * (Np * Xp * Hp + Ep * Ap * Hp)                       # encoders
        + n_layers * 2 * (Ep * Np * Hp + Np * Ep * Hp           # gather + scatter
                          + 2 * Np * Hp * Hp)                   # MLP
        + 2 * (Gp * Np * Hp + Gp * Hp * Cp)                     # pool + fc_out
    )
    bytes_accessed = sum(int(a.size) * a.dtype.itemsize for a in operands) \
        + Gp * Cp * 4

    logits_p = pl.pallas_call(
        kernel,
        out_shape=jax.ShapeDtypeStruct((Gp, Cp), jnp.float32),
        in_specs=[vmem] * len(operands),
        out_specs=vmem,
        cost_estimate=pl.CostEstimate(flops=flops, transcendentals=0,
                                      bytes_accessed=bytes_accessed),
    )(*operands)
    return logits_p[:num_graphs, :out_dim]


# ----------------------------------------------------------------------------
# Pure-JAX reference (unfused, f32, explicit BN) for a correctness check
# ----------------------------------------------------------------------------
def gin_reference(p, x, edge_index, batch, edge_attr, num_graphs):
    src, dst = edge_index[0], edge_index[1]
    h = x @ p["node_w"] + p["node_b"]
    ea = edge_attr @ p["edge_w"] + p["edge_b"]
    for cp in p["convs"]:
        msg = jax.nn.relu(h[src] + ea)
        aggr = jnp.zeros_like(h).at[dst].add(msg)
        z = h + aggr
        t = z @ cp["w1"] + cp["b1"]
        t = (t - cp["bn_mean"]) * jax.lax.rsqrt(cp["bn_var"] + BN_EPS) \
            * cp["bn_gamma"] + cp["bn_beta"]
        t = jax.nn.relu(t)
        t = t @ cp["w2"] + cp["b2"]
        h = jax.nn.relu(t)
    g = jnp.zeros((num_graphs, h.shape[1]), h.dtype).at[batch].add(h)
    return g @ p["out_w"] + p["out_b"]


# ----------------------------------------------------------------------------
if __name__ == "__main__":
    # small synthetic graph batch
    N, E, G = 16, 32, 2                 # nodes, edges, graphs
    X_DIM, EDGE_ATTR_DIM = 8, 4
    HIDDEN, N_LAYERS = 32, 2
    NUM_CLASS, MULTI_LABEL = 3, False
    OUT_DIM = 1 if (NUM_CLASS == 2 and not MULTI_LABEL) else NUM_CLASS

    key = jax.random.PRNGKey(0)
    k_x, k_ea, k_src, k_dst, k_par = jax.random.split(key, 5)

    x = jax.random.normal(k_x, (N, X_DIM), jnp.float32)
    edge_attr = jax.random.normal(k_ea, (E, EDGE_ATTR_DIM), jnp.float32)
    src = jax.random.randint(k_src, (E,), 0, N, jnp.int32)
    dst = jax.random.randint(k_dst, (E,), 0, N, jnp.int32)
    edge_index = jnp.stack([src, dst], axis=0)                       # [2, E]
    batch = jnp.concatenate(
        [jnp.zeros((N // 2,), jnp.int32), jnp.ones((N - N // 2,), jnp.int32)]
    )                                                                # [N]

    params = init_params(k_par, X_DIM, EDGE_ATTR_DIM, HIDDEN, N_LAYERS, OUT_DIM)
    prep = prepare_inference_params(params, X_DIM, EDGE_ATTR_DIM, HIDDEN, OUT_DIM)

    logits = gin_forward(
        prep, x, edge_index, batch, edge_attr,
        num_nodes=N, num_graphs=G, n_layers=N_LAYERS, out_dim=OUT_DIM,
    )
    jax.block_until_ready(logits)
    assert logits.shape == (G, OUT_DIM)

    ref = gin_reference(params, x, edge_index, batch, edge_attr, G)
    max_err = float(jnp.max(jnp.abs(logits - ref)))
    tol = 5e-2 * max(1.0, float(jnp.max(jnp.abs(ref))))
    assert max_err < tol, f"mismatch vs reference: {max_err} (tol {tol})"

    print("KERNEL_OK")
</pallas_src>

<mosaic_0001>
module attributes {stable_mosaic.version = 11 : i64} {
  func.func @gin_fused_kernel(%arg0: memref<16x8xf32, #tpu.memory_space<vmem>>, %arg1: memref<32x8xf32, #tpu.memory_space<vmem>>, %arg2: memref<32x1xi32, #tpu.memory_space<vmem>>, %arg3: memref<1x32xi32, #tpu.memory_space<vmem>>, %arg4: memref<1x16xi32, #tpu.memory_space<vmem>>, %arg5: memref<8x128xbf16, #tpu.memory_space<vmem>>, %arg6: memref<1x128xf32, #tpu.memory_space<vmem>>, %arg7: memref<8x128xbf16, #tpu.memory_space<vmem>>, %arg8: memref<1x128xf32, #tpu.memory_space<vmem>>, %arg9: memref<2x128x128xbf16, #tpu.memory_space<vmem>>, %arg10: memref<2x1x128xf32, #tpu.memory_space<vmem>>, %arg11: memref<2x128x128xbf16, #tpu.memory_space<vmem>>, %arg12: memref<2x1x128xf32, #tpu.memory_space<vmem>>, %arg13: memref<128x128xbf16, #tpu.memory_space<vmem>>, %arg14: memref<1x128xf32, #tpu.memory_space<vmem>>, %arg15: memref<8x128xf32, #tpu.memory_space<vmem>>) attributes {dimension_semantics = [], scalar_prefetch = 0 : i64, scratch_operands = 0 : i64, tpu.core_type = #tpu.core_type<tc>} {
    %c0 = arith.constant 0 : index
    %c0_0 = arith.constant 0 : index
    %0 = vector.load %arg0[%c0, %c0_0] : memref<16x8xf32, #tpu.memory_space<vmem>>, vector<16x8xf32>
    %1 = arith.truncf %0 : vector<16x8xf32> to vector<16x8xbf16>
    %c0_1 = arith.constant 0 : index
    %c0_2 = arith.constant 0 : index
    %2 = vector.load %arg5[%c0_1, %c0_2] : memref<8x128xbf16, #tpu.memory_space<vmem>>, vector<8x128xbf16>
    %cst = arith.constant dense<0.000000e+00> : vector<16x128xf32>
    %3 = tpu.matmul %1, %2, %cst {dimension_numbers = #tpu.dot_dimension_numbers<[1], [0], [0], [1], [0, 0, 1, 1], [], []>} : vector<16x8xbf16>, vector<8x128xbf16>, vector<16x128xf32> -> vector<16x128xf32>
    %c0_3 = arith.constant 0 : index
    %c0_4 = arith.constant 0 : index
    %4 = vector.load %arg6[%c0_3, %c0_4] : memref<1x128xf32, #tpu.memory_space<vmem>>, vector<1x128xf32>
    %5 = vector.broadcast %4 : vector<1x128xf32> to vector<16x128xf32>
    %6 = arith.addf %3, %5 : vector<16x128xf32>
    %c0_5 = arith.constant 0 : index
    %c0_6 = arith.constant 0 : index
    %7 = vector.load %arg1[%c0_5, %c0_6] : memref<32x8xf32, #tpu.memory_space<vmem>>, vector<32x8xf32>
    %8 = arith.truncf %7 : vector<32x8xf32> to vector<32x8xbf16>
    %c0_7 = arith.constant 0 : index
    %c0_8 = arith.constant 0 : index
    %9 = vector.load %arg7[%c0_7, %c0_8] : memref<8x128xbf16, #tpu.memory_space<vmem>>, vector<8x128xbf16>
    %cst_9 = arith.constant dense<0.000000e+00> : vector<32x128xf32>
    %10 = tpu.matmul %8, %9, %cst_9 {dimension_numbers = #tpu.dot_dimension_numbers<[1], [0], [0], [1], [0, 0, 1, 1], [], []>} : vector<32x8xbf16>, vector<8x128xbf16>, vector<32x128xf32> -> vector<32x128xf32>
    %c0_10 = arith.constant 0 : index
    %c0_11 = arith.constant 0 : index
    %11 = vector.load %arg8[%c0_10, %c0_11] : memref<1x128xf32, #tpu.memory_space<vmem>>, vector<1x128xf32>
    %12 = vector.broadcast %11 : vector<1x128xf32> to vector<32x128xf32>
    %13 = arith.addf %10, %12 : vector<32x128xf32>
    %14 = tpu.iota {dimensions = array<i32: 1>} : vector<32x16xi32>
    %c0_12 = arith.constant 0 : index
    %c0_13 = arith.constant 0 : index
    %15 = vector.load %arg2[%c0_12, %c0_13] : memref<32x1xi32, #tpu.memory_space<vmem>>, vector<32x1xi32>
    %16 = vector.broadcast %15 : vector<32x1xi32> to vector<32x16xi32>
    %17 = arith.cmpi eq, %16, %14 : vector<32x16xi32>
    %cst_14 = arith.constant 1.000000e+00 : f32
    %cst_15 = arith.constant 0.000000e+00 : f32
    %18 = vector.broadcast %cst_14 : f32 to vector<32x16xf32>
    %19 = vector.broadcast %cst_15 : f32 to vector<32x16xf32>
    %20 = arith.select %17, %18, %19 : vector<32x16xi1>, vector<32x16xf32>
    %21 = arith.truncf %20 : vector<32x16xf32> to vector<32x16xbf16>
    %22 = tpu.iota {dimensions = array<i32: 0>} : vector<16x32xi32>
    %c0_16 = arith.constant 0 : index
    %c0_17 = arith.constant 0 : index
    %23 = vector.load %arg3[%c0_16, %c0_17] : memref<1x32xi32, #tpu.memory_space<vmem>>, vector<1x32xi32>
    %24 = vector.broadcast %23 : vector<1x32xi32> to vector<16x32xi32>
    %25 = arith.cmpi eq, %24, %22 : vector<16x32xi32>
    %cst_18 = arith.constant 1.000000e+00 : f32
    %cst_19 = arith.constant 0.000000e+00 : f32
    %26 = vector.broadcast %cst_18 : f32 to vector<16x32xf32>
    %27 = vector.broadcast %cst_19 : f32 to vector<16x32xf32>
    %28 = arith.select %25, %26, %27 : vector<16x32xi1>, vector<16x32xf32>
    %29 = arith.truncf %28 : vector<16x32xf32> to vector<16x32xbf16>
    %30 = tpu.iota {dimensions = array<i32: 0>} : vector<8x16xi32>
    %c0_20 = arith.constant 0 : index
    %c0_21 = arith.constant 0 : index
    %31 = vector.load %arg4[%c0_20, %c0_21] : memref<1x16xi32, #tpu.memory_space<vmem>>, vector<1x16xi32>
    %32 = vector.broadcast %31 : vector<1x16xi32> to vector<8x16xi32>
    %33 = arith.cmpi eq, %32, %30 : vector<8x16xi32>
    %cst_22 = arith.constant 1.000000e+00 : f32
    %cst_23 = arith.constant 0.000000e+00 : f32
    %34 = vector.broadcast %cst_22 : f32 to vector<8x16xf32>
    %35 = vector.broadcast %cst_23 : f32 to vector<8x16xf32>
    %36 = arith.select %33, %34, %35 : vector<8x16xi1>, vector<8x16xf32>
    %37 = arith.truncf %36 : vector<8x16xf32> to vector<8x16xbf16>
    %38 = arith.truncf %6 : vector<16x128xf32> to vector<16x128xbf16>
    %cst_24 = arith.constant dense<0.000000e+00> : vector<32x128xf32>
    %39 = tpu.matmul %21, %38, %cst_24 {dimension_numbers = #tpu.dot_dimension_numbers<[1], [0], [0], [1], [0, 0, 1, 1], [], []>} : vector<32x16xbf16>, vector<16x128xbf16>, vector<32x128xf32> -> vector<32x128xf32>
    %40 = arith.addf %39, %13 : vector<32x128xf32>
    %cst_25 = arith.constant 0.000000e+00 : f32
    %41 = vector.broadcast %cst_25 : f32 to vector<32x128xf32>
    %42 = arith.maximumf %40, %41 : vector<32x128xf32>
    %43 = arith.truncf %42 : vector<32x128xf32> to vector<32x128xbf16>
    %cst_26 = arith.constant dense<0.000000e+00> : vector<16x128xf32>
    %44 = tpu.matmul %29, %43, %cst_26 {dimension_numbers = #tpu.dot_dimension_numbers<[1], [0], [0], [1], [0, 0, 1, 1], [], []>} : vector<16x32xbf16>, vector<32x128xbf16>, vector<16x128xf32> -> vector<16x128xf32>
    %45 = arith.addf %6, %44 : vector<16x128xf32>
    %46 = arith.truncf %45 : vector<16x128xf32> to vector<16x128xbf16>
    %c0_27 = arith.constant 0 : index
    %c0_28 = arith.constant 0 : index
    %c0_29 = arith.constant 0 : index
    %47 = vector.load %arg9[%c0_27, %c0_28, %c0_29] : memref<2x128x128xbf16, #tpu.memory_space<vmem>>, vector<1x128x128xbf16>
    %48 = vector.shape_cast %47 : vector<1x128x128xbf16> to vector<128x128xbf16>
    %cst_30 = arith.constant dense<0.000000e+00> : vector<16x128xf32>
    %49 = tpu.matmul %46, %48, %cst_30 {dimension_numbers = #tpu.dot_dimension_numbers<[1], [0], [0], [1], [0, 0, 1, 1], [], []>} : vector<16x128xbf16>, vector<128x128xbf16>, vector<16x128xf32> -> vector<16x128xf32>
    %c0_31 = arith.constant 0 : index
    %c0_32 = arith.constant 0 : index
    %c0_33 = arith.constant 0 : index
    %50 = vector.load %arg10[%c0_31, %c0_32, %c0_33] : memref<2x1x128xf32, #tpu.memory_space<vmem>>, vector<1x1x128xf32>
    %51 = vector.shape_cast %50 : vector<1x1x128xf32> to vector<1x128xf32>
    %52 = vector.broadcast %51 : vector<1x128xf32> to vector<16x128xf32>
    %53 = arith.addf %49, %52 : vector<16x128xf32>
    %cst_34 = arith.constant 0.000000e+00 : f32
    %54 = vector.broadcast %cst_34 : f32 to vector<16x128xf32>
    %55 = arith.maximumf %53, %54 : vector<16x128xf32>
    %56 = arith.truncf %55 : vector<16x128xf32> to vector<16x128xbf16>
    %c0_35 = arith.constant 0 : index
    %c0_36 = arith.constant 0 : index
    %c0_37 = arith.constant 0 : index
    %57 = vector.load %arg11[%c0_35, %c0_36, %c0_37] : memref<2x128x128xbf16, #tpu.memory_space<vmem>>, vector<1x128x128xbf16>
    %58 = vector.shape_cast %57 : vector<1x128x128xbf16> to vector<128x128xbf16>
    %cst_38 = arith.constant dense<0.000000e+00> : vector<16x128xf32>
    %59 = tpu.matmul %56, %58, %cst_38 {dimension_numbers = #tpu.dot_dimension_numbers<[1], [0], [0], [1], [0, 0, 1, 1], [], []>} : vector<16x128xbf16>, vector<128x128xbf16>, vector<16x128xf32> -> vector<16x128xf32>
    %c0_39 = arith.constant 0 : index
    %c0_40 = arith.constant 0 : index
    %c0_41 = arith.constant 0 : index
    %60 = vector.load %arg12[%c0_39, %c0_40, %c0_41] : memref<2x1x128xf32, #tpu.memory_space<vmem>>, vector<1x1x128xf32>
    %61 = vector.shape_cast %60 : vector<1x1x128xf32> to vector<1x128xf32>
    %62 = vector.broadcast %61 : vector<1x128xf32> to vector<16x128xf32>
    %63 = arith.addf %59, %62 : vector<16x128xf32>
    %cst_42 = arith.constant 0.000000e+00 : f32
    %64 = vector.broadcast %cst_42 : f32 to vector<16x128xf32>
    %65 = arith.maximumf %63, %64 : vector<16x128xf32>
    %66 = arith.truncf %65 : vector<16x128xf32> to vector<16x128xbf16>
    %cst_43 = arith.constant dense<0.000000e+00> : vector<32x128xf32>
    %67 = tpu.matmul %21, %66, %cst_43 {dimension_numbers = #tpu.dot_dimension_numbers<[1], [0], [0], [1], [0, 0, 1, 1], [], []>} : vector<32x16xbf16>, vector<16x128xbf16>, vector<32x128xf32> -> vector<32x128xf32>
    %68 = arith.addf %67, %13 : vector<32x128xf32>
    %cst_44 = arith.constant 0.000000e+00 : f32
    %69 = vector.broadcast %cst_44 : f32 to vector<32x128xf32>
    %70 = arith.maximumf %68, %69 : vector<32x128xf32>
    %71 = arith.truncf %70 : vector<32x128xf32> to vector<32x128xbf16>
    %cst_45 = arith.constant dense<0.000000e+00> : vector<16x128xf32>
    %72 = tpu.matmul %29, %71, %cst_45 {dimension_numbers = #tpu.dot_dimension_numbers<[1], [0], [0], [1], [0, 0, 1, 1], [], []>} : vector<16x32xbf16>, vector<32x128xbf16>, vector<16x128xf32> -> vector<16x128xf32>
    %73 = arith.addf %65, %72 : vector<16x128xf32>
    %74 = arith.truncf %73 : vector<16x128xf32> to vector<16x128xbf16>
    %c1 = arith.constant 1 : index
    %c0_46 = arith.constant 0 : index
    %c0_47 = arith.constant 0 : index
    %75 = vector.load %arg9[%c1, %c0_46, %c0_47] : memref<2x128x128xbf16, #tpu.memory_space<vmem>>, vector<1x128x128xbf16>
    %76 = vector.shape_cast %75 : vector<1x128x128xbf16> to vector<128x128xbf16>
    %cst_48 = arith.constant dense<0.000000e+00> : vector<16x128xf32>
    %77 = tpu.matmul %74, %76, %cst_48 {dimension_numbers = #tpu.dot_dimension_numbers<[1], [0], [0], [1], [0, 0, 1, 1], [], []>} : vector<16x128xbf16>, vector<128x128xbf16>, vector<16x128xf32> -> vector<16x128xf32>
    %c1_49 = arith.constant 1 : index
    %c0_50 = arith.constant 0 : index
    %c0_51 = arith.constant 0 : index
    %78 = vector.load %arg10[%c1_49, %c0_50, %c0_51] : memref<2x1x128xf32, #tpu.memory_space<vmem>>, vector<1x1x128xf32>
    %79 = vector.shape_cast %78 : vector<1x1x128xf32> to vector<1x128xf32>
    %80 = vector.broadcast %79 : vector<1x128xf32> to vector<16x128xf32>
    %81 = arith.addf %77, %80 : vector<16x128xf32>
    %cst_52 = arith.constant 0.000000e+00 : f32
    %82 = vector.broadcast %cst_52 : f32 to vector<16x128xf32>
    %83 = arith.maximumf %81, %82 : vector<16x128xf32>
    %84 = arith.truncf %83 : vector<16x128xf32> to vector<16x128xbf16>
    %c1_53 = arith.constant 1 : index
    %c0_54 = arith.constant 0 : index
    %c0_55 = arith.constant 0 : index
    %85 = vector.load %arg11[%c1_53, %c0_54, %c0_55] : memref<2x128x128xbf16, #tpu.memory_space<vmem>>, vector<1x128x128xbf16>
    %86 = vector.shape_cast %85 : vector<1x128x128xbf16> to vector<128x128xbf16>
    %cst_56 = arith.constant dense<0.000000e+00> : vector<16x128xf32>
    %87 = tpu.matmul %84, %86, %cst_56 {dimension_numbers = #tpu.dot_dimension_numbers<[1], [0], [0], [1], [0, 0, 1, 1], [], []>} : vector<16x128xbf16>, vector<128x128xbf16>, vector<16x128xf32> -> vector<16x128xf32>
    %c1_57 = arith.constant 1 : index
    %c0_58 = arith.constant 0 : index
    %c0_59 = arith.constant 0 : index
    %88 = vector.load %arg12[%c1_57, %c0_58, %c0_59] : memref<2x1x128xf32, #tpu.memory_space<vmem>>, vector<1x1x128xf32>
    %89 = vector.shape_cast %88 : vector<1x1x128xf32> to vector<1x128xf32>
    %90 = vector.broadcast %89 : vector<1x128xf32> to vector<16x128xf32>
    %91 = arith.addf %87, %90 : vector<16x128xf32>
    %cst_60 = arith.constant 0.000000e+00 : f32
    %92 = vector.broadcast %cst_60 : f32 to vector<16x128xf32>
    %93 = arith.maximumf %91, %92 : vector<16x128xf32>
    %94 = arith.truncf %93 : vector<16x128xf32> to vector<16x128xbf16>
    %cst_61 = arith.constant dense<0.000000e+00> : vector<8x128xf32>
    %95 = tpu.matmul %37, %94, %cst_61 {dimension_numbers = #tpu.dot_dimension_numbers<[1], [0], [0], [1], [0, 0, 1, 1], [], []>} : vector<8x16xbf16>, vector<16x128xbf16>, vector<8x128xf32> -> vector<8x128xf32>
    %96 = arith.truncf %95 : vector<8x128xf32> to vector<8x128xbf16>
    %c0_62 = arith.constant 0 : index
    %c0_63 = arith.constant 0 : index
    %97 = vector.load %arg13[%c0_62, %c0_63] : memref<128x128xbf16, #tpu.memory_space<vmem>>, vector<128x128xbf16>
    %cst_64 = arith.constant dense<0.000000e+00> : vector<8x128xf32>
    %98 = tpu.matmul %96, %97, %cst_64 {dimension_numbers = #tpu.dot_dimension_numbers<[1], [0], [0], [1], [0, 0, 1, 1], [], []>} : vector<8x128xbf16>, vector<128x128xbf16>, vector<8x128xf32> -> vector<8x128xf32>
    %c0_65 = arith.constant 0 : index
    %c0_66 = arith.constant 0 : index
    %99 = vector.load %arg14[%c0_65, %c0_66] : memref<1x128xf32, #tpu.memory_space<vmem>>, vector<1x128xf32>
    %100 = vector.broadcast %99 : vector<1x128xf32> to vector<8x128xf32>
    %101 = arith.addf %98, %100 : vector<8x128xf32>
    %c0_67 = arith.constant 0 : index
    %c0_68 = arith.constant 0 : index
    %102 = vector.load %arg15[%c0_67, %c0_68] : memref<8x128xf32, #tpu.memory_space<vmem>>, vector<8x128xf32>
    tpu.vector_store %arg15[%c0_67, %c0_68], %101 {strides = array<i32>} : memref<8x128xf32, #tpu.memory_space<vmem>>, vector<8x128xf32>,
    return
  }
}

</mosaic_0001>

<bundles_post_ra>
// kernel: gin_forward.1
= control target key start
LH: loop header
LB: loop body
LE: loop exit
PB: predicated region body
PF: predicated region fallthrough
CT: control target
= control target key end

     0   :  { %20 = vsyncpa [#allocation3], 0  ;;  %s2106_s0 = inlined_call_operand.vmem [shape: f32[16,8], index: 0, kind: input, shape index: {}]   ;;  %s2107_s1 = inlined_call_operand.vmem [shape: f32[32,8], index: 1, kind: input, shape index: {}]   ;;  %s2108_s2 = inlined_call_operand.vmem [shape: s32[32,1], index: 2, kind: input, shape index: {}]   ;;  %s2109_s3 = inlined_call_operand.vmem [shape: s32[1,32], index: 3, kind: input, shape index: {}]   ;;  %s2110_s4 = inlined_call_operand.vmem [shape: s32[1,16], index: 4, kind: input, shape index: {}]   ;;  %s2111_s5 = inlined_call_operand.vmem [shape: bf16[8,128], index: 5, kind: input, shape index: {}]   ;;  %s2112_s6 = inlined_call_operand.hbm [shape: f32[1,128], index: 6, kind: input, shape index: {}]   ;;  %s2113_s7 = inlined_call_operand.hbm [shape: bf16[8,128], index: 7, kind: input, shape index: {}]   ;;  %s2114_s8 = inlined_call_operand.hbm [shape: f32[1,128], index: 8, kind: input, shape index: {}]   ;;  %s2115_s9 = inlined_call_operand.vmem [shape: bf16[2,128,128], index: 9, kind: input, shape index: {}]   ;;  %s2116_s10 = inlined_call_operand.hbm [shape: f32[2,1,128], index: 10, kind: input, shape index: {}]   ;;  %s2117_s11 = inlined_call_operand.hbm [shape: bf16[2,128,128], index: 11, kind: input, shape index: {}]   ;;  %s2118_s12 = inlined_call_operand.hbm [shape: f32[2,1,128], index: 12, kind: input, shape index: {}]   ;;  %s2119_s13 = inlined_call_operand.vmem [shape: bf16[128,128], index: 13, kind: input, shape index: {}]   ;;  %s2120_s14 = inlined_call_operand.hbm [shape: f32[1,128], index: 14, kind: input, shape index: {}]   ;;  %s2121_s15 = inlined_call_operand.vmem [shape: f32[8,128], index: 15, kind: output, shape index: {}]  }
   0x1   :  { %21 = vsyncpa [#allocation5], 0 }
   0x2   :  { %22 = vsyncpa [#allocation8], 0 }
   0x3   :  { %23 = vsyncpa [#allocation11], 0  ;;  %s1661_s18 = smov [#allocation4]   ;;  %s1662_s20 = smov [#allocation7]  }
   0x4   :  { %s52_s19 = sshll.u32 %s1661_s18, 4  ;;  %s73_s21 = sshll.u32 %s1662_s20, 4  ;;  %s53_s19 = int_to_ptr.vmem [resolvable:$true] %s52_s19  ;;  %s1755_s21 = int_to_ptr.vmem [resolvable:$true] %s73_s21 }
   0x5   :  { %s1499_s24 = scalar_lea.hbm %s2113_s7, 64 }
   0x6   :  { %p1500_p0 = scmp.ne.s32.totalorder %s2113_s7, %s1499_s24  ;;  %p1503_p1 = scmp.lt.u32.totalorder %s1499_s24, %s2113_s7 }
   0x8   :  { %p1505_p2 = pnand %p1503_p1, %p1500_p0 }
   0xa   :  { %1508 = shalt.err (!%p1505_p2)
}
   0xb   :  { %s1509_s29 = scalar_lea.vmem %s53_s19, 64  ;;  %p1514_p4 = scmp.lt.s32.totalorder %s53_s19, %s53_s19 }
   0xc   :  { %p1510_p3 = scmp.ne.s32.totalorder %s53_s19, %s1509_s29  ;;  %p1515_p5 = scmp.lt.s32.totalorder %s1509_s29, %s1509_s29 }
   0xe   :  { %p1516_p6 = por %p1515_p5, %p1514_p4 }
  0x10   :  { %p1517_p7 = pnand %p1516_p6, %p1510_p3 }
  0x12   :  { %1520 = shalt.err (!%p1517_p7)
}
  0x13   :  { %55 = dma.hbm_to_vmem [thread:$0]  %s2113_s7, 64, %s53_s19, [#allocation5]  }
  0x14   :  { %s1521_s20 = scalar_lea.hbm %s2116_s10, 32 }
  0x15   :  { %p1522_p8 = scmp.ne.s32.totalorder %s2116_s10, %s1521_s20  ;;  %p1525_p9 = scmp.lt.u32.totalorder %s1521_s20, %s2116_s10 }
  0x17   :  { %p1527_p10 = pnand %p1525_p9, %p1522_p8 }
  0x19   :  { %1530 = shalt.err (!%p1527_p10)
}
  0x1a   :  { %s1531_s26 = scalar_lea.vmem %s1755_s21, 32  ;;  %p1536_p12 = scmp.lt.s32.totalorder %s1755_s21, %s1755_s21 }
  0x1b   :  { %p1532_p11 = scmp.ne.s32.totalorder %s1755_s21, %s1531_s26  ;;  %p1537_p13 = scmp.lt.s32.totalorder %s1531_s26, %s1531_s26 }
  0x1d   :  { %p1538_p0 = por %p1537_p13, %p1536_p12 }
  0x1f   :  { %p1539_p1 = pnand %p1538_p0, %p1532_p11 }
  0x21   :  { %1542 = shalt.err (!%p1539_p1)
}
  0x22   :  { %s1663_s7 = smov 16   ;;  %s1664_s19 = smov 1  }
  0x23   :  { %79 = dma.hbm_to_vmem [thread:$0]  %s2116_s10, 32, %s1755_s21, [#allocation8], %s1663_s7, %s1663_s7, %s1664_s19  }
  0x24   :  { %s1665_s29 = smov [#allocation10]   ;;  %s1666_s16 = smov [#allocation2]  }
  0x25   :  { %s97_s30 = sshll.u32 %s1665_s29, 4  ;;  %s42_s17 = sshll.u32 %s1666_s16, 4  ;;  %s98_s30 = int_to_ptr.vmem [resolvable:$true] %s97_s30  ;;  %s43_s17 = int_to_ptr.vmem [resolvable:$true] %s42_s17 }
  0x26   :  { %s1543_s22 = scalar_lea.hbm %s2118_s12, 32 }
  0x27   :  { %p1544_p2 = scmp.ne.s32.totalorder %s2118_s12, %s1543_s22  ;;  %p1547_p3 = scmp.lt.u32.totalorder %s1543_s22, %s2118_s12 }
  0x29   :  { %p1549_p4 = pnand %p1547_p3, %p1544_p2 }
  0x2b   :  { %1552 = shalt.err (!%p1549_p4)
}
  0x2c   :  { %s1553_s10 = scalar_lea.vmem %s98_s30, 32  ;;  %p1558_p6 = scmp.lt.s32.totalorder %s98_s30, %s98_s30 }
  0x2d   :  { %p1554_p5 = scmp.ne.s32.totalorder %s98_s30, %s1553_s10  ;;  %p1559_p7 = scmp.lt.s32.totalorder %s1553_s10, %s1553_s10 }
  0x2f   :  { %p1560_p8 = por %p1559_p7, %p1558_p6 }
  0x31   :  { %p1561_p9 = pnand %p1560_p8, %p1554_p5 }
  0x33   :  { %1564 = shalt.err (!%p1561_p9)
}
  0x34   :  { %103 = dma.hbm_to_vmem [thread:$0]  %s2118_s12, 32, %s98_s30, [#allocation11], %s1663_s7, %s1663_s7, %s1664_s19  }
  0x35   :  { %s1565_s16 = scalar_lea.hbm %s2112_s6, 16 }
  0x36   :  { %p1566_p10 = scmp.ne.s32.totalorder %s2112_s6, %s1565_s16  ;;  %p1569_p11 = scmp.lt.u32.totalorder %s1565_s16, %s2112_s6 }
  0x38   :  { %p1571_p12 = pnand %p1569_p11, %p1566_p10 }
  0x3a   :  { %1574 = shalt.err (!%p1571_p12)
}
  0x3b   :  { %s1575_s24 = scalar_lea.vmem %s43_s17, 16  ;;  %s1579_s25 = scalar_lea.vmem %s43_s17, 32 }
  0x3c   :  { %p1576_p13 = scmp.ne.s32.totalorder %s43_s17, %s1575_s24  ;;  %p1580_p0 = scmp.lt.s32.totalorder %s43_s17, %s43_s17 }
  0x3d   :  { %p1581_p1 = scmp.lt.s32.totalorder %s1579_s25, %s1575_s24 }
  0x3f   :  { %p1582_p2 = por %p1581_p1, %p1580_p0 }
  0x41   :  { %p1583_p3 = pnand %p1582_p2, %p1576_p13 }
  0x43   :  { %1586 = shalt.err (!%p1583_p3)
}
  0x44   :  { %45 = dma.hbm_to_vmem [thread:$0]  %s2112_s6, 16, %s43_s17, [#allocation3]  }
  0x45   :  { %s1667_s19 = smov [#allocation6]   ;;  %s1668_s26 = smov [#allocation9]  }
  0x46   :  { %s62_s30 = sshll.u32 %s1667_s19, 4  ;;  %s85_s10 = sshll.u32 %s1668_s26, 4  ;;  %s63_s30 = int_to_ptr.vmem [resolvable:$true] %s62_s30  ;;  %s1810_s10 = int_to_ptr.vmem [resolvable:$true] %s85_s10 }
  0x47   :  { %s1587_s28 = scalar_lea.hbm %s2114_s8, 16 }
  0x48   :  { %p1588_p4 = scmp.ne.s32.totalorder %s2114_s8, %s1587_s28  ;;  %p1591_p5 = scmp.lt.u32.totalorder %s1587_s28, %s2114_s8 }
  0x4a   :  { %p1593_p6 = pnand %p1591_p5, %p1588_p4 }
  0x4c   :  { %1596 = shalt.err (!%p1593_p6)
}
  0x4d   :  { %s1597_s6 = scalar_lea.vmem %s63_s30, 16  ;;  %s1601_s17 = scalar_lea.vmem %s63_s30, 32 }
  0x4e   :  { %p1598_p7 = scmp.ne.s32.totalorder %s63_s30, %s1597_s6  ;;  %p1602_p8 = scmp.lt.s32.totalorder %s63_s30, %s63_s30 }
  0x4f   :  { %p1603_p9 = scmp.lt.s32.totalorder %s1601_s17, %s1597_s6 }
  0x51   :  { %p1604_p10 = por %p1603_p9, %p1602_p8 }
  0x53   :  { %p1605_p11 = pnand %p1604_p10, %p1598_p7 }
  0x55   :  { %1608 = shalt.err (!%p1605_p11)
}
  0x56   :  { %65 = dma.hbm_to_vmem [thread:$0]  %s2114_s8, 16, %s63_s30, [#allocation5]  }
  0x57   :  { %s1609_s12 = scalar_lea.hbm %s2117_s11, 2048 }
  0x58   :  { %p1610_p12 = scmp.ne.s32.totalorder %s2117_s11, %s1609_s12  ;;  %p1613_p13 = scmp.lt.u32.totalorder %s1609_s12, %s2117_s11 }
  0x5a   :  { %p1615_p0 = pnand %p1613_p13, %p1610_p12 }
  0x5c   :  { %1618 = shalt.err (!%p1615_p0)
}
  0x5d   :  { %s1619_s27 = scalar_lea.vmem %s1810_s10, 2048  ;;  %p1624_p2 = scmp.lt.s32.totalorder %s1810_s10, %s1810_s10 }
  0x5e   :  { %p1620_p1 = scmp.ne.s32.totalorder %s1810_s10, %s1619_s27  ;;  %p1625_p3 = scmp.lt.s32.totalorder %s1619_s27, %s1619_s27 }
  0x60   :  { %p1626_p4 = por %p1625_p3, %p1624_p2 }
  0x62   :  { %p1627_p5 = pnand %p1626_p4, %p1620_p1 }
  0x64   :  { %1630 = shalt.err (!%p1627_p5)
}
  0x65   :  { %s1669_s8 = smov 64   ;;  %s1670_s30 = smov 4  }
  0x66   :  { %91 = dma.hbm_to_vmem [thread:$0]  %s2117_s11, 2048, %s1810_s10, [#allocation8], %s1669_s8, %s1669_s8, %s1670_s30  }
  0x67   :  { %s1671_s16 = smov [#allocation12]   ;;  %s1631_s17 = scalar_lea.hbm %s2120_s14, 16 }
  0x68   :  { %s112_s18 = sshll.u32 %s1671_s16, 4  ;;  %p1632_p6 = scmp.ne.s32.totalorder %s2120_s14, %s1631_s17  ;;  %s113_s18 = int_to_ptr.vmem [resolvable:$true] %s112_s18 }
  0x69   :  { %p1635_p7 = scmp.lt.u32.totalorder %s1631_s17, %s2120_s14 }
  0x6b   :  { %p1637_p8 = pnand %p1635_p7, %p1632_p6 }
  0x6d   :  { %1640 = shalt.err (!%p1637_p8)
}
  0x6e   :  { %s1641_s12 = scalar_lea.vmem %s113_s18, 16  ;;  %s1645_s11 = scalar_lea.vmem %s113_s18, 32 }
  0x6f   :  { %p1642_p9 = scmp.ne.s32.totalorder %s113_s18, %s1641_s12  ;;  %p1646_p10 = scmp.lt.s32.totalorder %s113_s18, %s113_s18 }
  0x70   :  { %p1647_p11 = scmp.lt.s32.totalorder %s1645_s11, %s1641_s12 }
  0x72   :  { %p1648_p12 = por %p1647_p11, %p1646_p10 }
  0x74   :  { %p1649_p13 = pnand %p1648_p12, %p1642_p9 }
  0x76   :  { %1652 = shalt.err (!%p1649_p13)
}
  0x77   :  { %115 = dma.hbm_to_vmem [thread:$0]  %s2120_s14, 16, %s113_s18, [#allocation11]  }
  0x78   :  { %1653 = dma.done.wait [#allocation3], 16  }
  0x79   :  { %1654 = vsyncadd [#allocation3], 4294967280 }
  0x7a   :  { %1655 = dma.done.wait [#allocation5], 80  }
  0x7b   :  { %1656 = vsyncadd [#allocation5], 4294967216 }
  0x7c   :  { %1657 = dma.done.wait [#allocation8], 2080  }
  0x7d   :  { %1658 = vsyncadd [#allocation8], 4294965216 }
  0x7e   :  { %1659 = dma.done.wait [#allocation11], 48  }
  0x7f   :  { %1660 = vsyncadd [#allocation11], 4294967248  ;;  %v1672_v0 = vmov 0.0   ;;  %vm1673_vm0 = vmmov 0   ;;  %v1674_v1 = vmov 0   ;;  %vm153_vm1 = vcmask 1043456  }
  0x80   :  { %1296 = vmatprep.subr.bf16.mxu0 %v1672_v0  ;;  %1298 = vmatprep.mubr.msk.bf16.mxu0 %vm1673_vm0, %v1672_v0  ;;  %v141_v2 = vld [vmem:[%s2111_s5] sm:$0xf]  ;;  %v139_v4 = vld [vmem:[%s2106_s0 + $0x8] sm:$0xff]  ;;  %v274_v8 = vld [vmem:[%s2108_s2 + $0x10] sm:$0xff]  ;;  %vm149_vm2 = vcmask 64512   ;;  %v270_v19 = vlaneseq  ;;  %vm320_vm5 = vcmask 130048  }
  0x81   :  { %1457 = vset.pattern.permute.xlu0 %v1674_v1  ;;  %1458 = vset.pattern.permute.xlu1 %v1674_v1  ;;  %v138_v3 = vld [vmem:[%s2106_s0] sm:$0xff]  ;;  %v155_v5 = vsel %vm153_vm1, %v141_v2, 0  ;;  %v273_v9 = vld [vmem:[%s2108_s2 + $0x8] sm:$0xff]  ;;  %v275_v10 = vld [vmem:[%s2108_s2 + $0x18] sm:$0xff]  ;;  %vm382_vm10 = vcmask 261120  }
  0x82   :  { %v140_v6 = vpack.c.bf16 %v139_v4, %v138_v3  ;;  %v272_v7 = vld [vmem:[%s2108_s2] sm:$0xff]  ;;  %1297 = vmatpush3.bf16.msra.mxu0 %v155_v5  ;;  %283 = vperm.xlu1 %1458, %v274_v8   ;;  %v199_v14 = vld [vmem:[%s2107_s1 + $0x8] sm:$0xff]  ;;  %v200_v16 = vld [vmem:[%s2107_s1 + $0x10] sm:$0xff]  ;;  %v271_v20 = vand.u32 127, %v270_v19  ;;  %v1923_v46 = vshrl.u32 %v270_v19, 7 }
  0x83   :  { %277 = vperm.xlu0 %1457, %v272_v7   ;;  %v204_v11 = vld [vmem:[#allocation4] sm:$0xf]  ;;  %v201_v17 = vld [vmem:[%s2107_s1 + $0x18] sm:$0xff]  ;;  %v1157_v27 = vld [vmem:[#allocation2] ss:$0 sm:$0xff] }
  0x84   :  { %1442 = vmatprep.subr.msk.bf16.mxu1 %vm153_vm1, %v204_v11  ;;  %v219_v12 = vsel %vm153_vm1, %v204_v11, 0  ;;  %v198_v13 = vld [vmem:[%s2107_s1] sm:$0xff]  ;;  %v203_v18 = vpack.c.bf16 %v201_v17, %v200_v16  ;;  %v300_v56 = vadd.s32 8, %v1923_v46  ;;  %v1461_v7 = vld [vmem:[%s2115_s9 + $0x10] sm:$0xff]   ;;  %v1462_v8 = vld [vmem:[%s2115_s9 + $0x18] sm:$0xff]  }
  0x85   :  { %1299 = vmatmul.mubr.msk.bf16.vlgmr.msra.gmra.mrb[0].mxu0 %vm149_vm2, %v140_v6  ;;  %1303 = vmatpush3.bf16.msra.mxu1 %v219_v12  ;;  %v202_v15 = vpack.c.bf16 %v199_v14, %v198_v13  ;;  %v1159_v43 = vld [vmem:[#allocation6] ss:$0 sm:$0xff]  ;;  %v1162_v58 = vld [vmem:[%s2109_s3] ss:$0 sm:$0xff]  ;;  %v1460_v6 = vld [vmem:[%s2115_s9 + $0x8] sm:$0xff]  }
  0x86   :  { %286 = vperm.xlu1 %1458, %v275_v10   ;;  %1342 = vmatprep.subr.bf16.mxu1 %v1672_v0  ;;  %vm306_vm8 = vcmp.eq.s32.totalorder %v1162_v58, %v1923_v46  ;;  %vm307_vm9 = vcmp.eq.s32.totalorder %v1162_v58, %v300_v56  ;;  %v1459_v5 = vld [vmem:[%s2115_s9] sm:$0xff]   ;;  %v1464_v10 = vld [vmem:[%s2115_s9 + $0x28] sm:$0xff]   ;;  %v1465_v11 = vld [vmem:[%s2115_s9 + $0x30] sm:$0xff]  }
  0x87   :  { %280 = vperm.xlu0 %1457, %v273_v9   ;;  %1304 = vmatprep.mubr.msk.bf16.mxu1 %vm149_vm2, %v202_v15  ;;  %v308_v2 = vsel %vm306_vm8, 1.0, %v1672_v0  ;;  %v309_v3 = vsel %vm307_vm9, 1.0, %v1672_v0  ;;  %v1463_v9 = vld [vmem:[%s2115_s9 + $0x20] sm:$0xff]   ;;  %v1466_v12 = vld [vmem:[%s2115_s9 + $0x38] sm:$0xff]   ;;  %v1467_v13 = vld [vmem:[#allocation9] sm:$0xff]  }
  0x88   :  { %1305 = vmatmul.mubr.msk.bf16.vlgmr.msra.gmra.mrb[0].mxu1 %vm149_vm2, %v203_v18  ;;  %v1941_v4 = vpack.c.bf16 %v309_v3, %v308_v2  ;;  %v1468_v14 = vld [vmem:[#allocation9 + $0x8] sm:$0xff]   ;;  %v1469_v15 = vld [vmem:[#allocation9 + $0x10] sm:$0xff]   ;;  %v1470_v16 = vld [vmem:[#allocation9 + $0x18] sm:$0xff]  }
  0x89   :  { %1358 = vmatprep.mubr.msk.bf16.mxu1 %vm1673_vm0, %v1672_v0  ;;  %1343 = vmatpush3.bf16.msra.mxu1 %v1467_v13  ;;  %v1471_v17 = vld [vmem:[#allocation9 + $0x20] sm:$0xff]   ;;  %v1472_v18 = vld [vmem:[#allocation9 + $0x28] sm:$0xff]  }
  0x8a   :  { %1344 = vmatprep.subr.bf16.mxu1 %v1672_v0  ;;  %v1477_v56 = vld [vmem:[%s2115_s9 + $0x50] sm:$0xff]   ;;  %v1480_v58 = vld [vmem:[%s2115_s9 + $0x68] sm:$0xff]  }
  0x8b   :  { %v1488_v13 = vld [vmem:[#allocation9 + $0x68] sm:$0xff]  }
  0x8d   :  { %1345 = vmatpush3.bf16.msra.mxu1 %v1468_v14 }
  0x8e   :  { %1346 = vmatprep.subr.bf16.mxu1 %v1672_v0 }
  0x91   :  { %1347 = vmatpush3.bf16.msra.mxu1 %v1469_v15 }
  0x92   :  { %1348 = vmatprep.subr.bf16.mxu1 %v1672_v0 }
  0x95   :  { %1349 = vmatpush3.bf16.msra.mxu1 %v1470_v16 }
  0x96   :  { %1350 = vmatprep.subr.bf16.mxu1 %v1672_v0 }
  0x99   :  { %1351 = vmatpush3.bf16.msra.mxu1 %v1471_v17 }
  0x9a   :  { %1352 = vmatprep.subr.bf16.mxu1 %v1672_v0 }
  0x9d   :  { %1353 = vmatpush3.bf16.msra.mxu1 %v1472_v18 }
  0x9e   :  { %1354 = vmatprep.subr.bf16.mxu1 %v1672_v0 }
 0x101   :  { %v284_v26 = vpop.permute.xlu1 %283 }
 0x102   :  { %v278_v21 = vpop.permute.xlu0 %277  ;;  %vm290_vm6 = vcmp.eq.s32.totalorder %v284_v26, %v271_v20 }
 0x103   :  { %vm288_vm3 = vcmp.eq.s32.totalorder %v278_v21, %v271_v20  ;;  %v294_v36 = vsel %vm290_vm6, 1.0, %v1672_v0 }
 0x104   :  { %v292_v22 = vsel %vm288_vm3, 1.0, %v1672_v0 }
 0x105   :  { %v287_v29 = vpop.permute.xlu1 %286 }
 0x106   :  { %v281_v23 = vpop.permute.xlu0 %280  ;;  %vm291_vm7 = vcmp.eq.s32.totalorder %v287_v29, %v271_v20  ;;  %v1167_v29 = vld [vmem:[#allocation7] ss:$0 sm:$0xff] }
 0x107   :  { %vm289_vm4 = vcmp.eq.s32.totalorder %v281_v23, %v271_v20  ;;  %v295_v37 = vsel %vm291_vm7, 1.0, %v1672_v0 }
 0x108   :  { %v293_v24 = vsel %vm289_vm4, 1.0, %v1672_v0  ;;  %v1912_v38 = vpack.c.bf16 %v295_v37, %v294_v36 }
 0x109   :  { %v1900_v25 = vpack.c.bf16 %v293_v24, %v292_v22 }
 0x10b   :  { %1310 = vmatprep.mubr.msk.bf16.mxu0 %vm320_vm5, %v1900_v25 }
 0x158   :  { %v191_v28 = vpop.f32.mrb[0].mxu0 }
 0x159   :  { %v1300_v30 = vpop.f32.mrb[1].mxu0  ;;  %v1904_v32 = vadd.f32 %v1157_v27, %v191_v28  ;;  %v1474_v28 = vld [vmem:[#allocation9 + $0x38] sm:$0xff]  }
 0x15a   :  { %v194_v31 = vpop.f32.mrb[2].mxu0 }
 0x15b   :  { %v1906_v33 = vadd.f32 %v1157_v27, %v194_v31  ;;  %v1301_v34 = vpop.f32.mrb[3].mxu0  ;;  %v1306_v39 = vpop.f32.mrb[0].mxu1  ;;  %v1473_v27 = vld [vmem:[#allocation9 + $0x30] sm:$0xff]  }
 0x15c   :  { %v255_v40 = vpop.f32.mrb[1].mxu1  ;;  %v1919_v44 = vadd.f32 %v1306_v39, %v1159_v43  ;;  %1355 = vmatpush3.bf16.msra.mxu1 %v1473_v27 }
 0x15d   :  { %v319_v35 = vpack.c.bf16 %v1906_v33, %v1904_v32  ;;  %v1307_v41 = vpop.f32.mrb[2].mxu1  ;;  %v1921_v45 = vadd.f32 %v1159_v43, %v255_v40  ;;  %1356 = vmatprep.subr.bf16.mxu1 %v1672_v0 }
 0x15e   :  { %v258_v42 = vpop.f32.mrb[3].mxu1  ;;  %v1925_v48 = vadd.f32 %v1307_v41, %v1159_v43 }
 0x15f   :  { %1308 = vmatprep.subr.bf16.mxu0 %v319_v35  ;;  %v1928_v51 = vadd.f32 %v1159_v43, %v258_v42 }
 0x160   :  { %1309 = vmatpush3.bf16.msra.mxu0 %v319_v35  ;;  %1357 = vmatpush3.bf16.msra.mxu1 %v1474_v28 }
 0x161   :  { %1314 = vmatprep.subr.bf16.mxu0 %v1672_v0  ;;  %1368 = vmatprep.subr.bf16.mxu1 %v1672_v0 }
 0x163   :  { %1311 = vmatmul.mubr.msk.bf16.vlgmr.msra.gmra.mrb[4].mxu0 %vm320_vm5, %v1912_v38 }
 0x164   :  { %1318 = vmatprep.mubr.msk.bf16.mxu0 %vm1673_vm0, %v1672_v0 }
 0x236   :  { %v1312_v47 = vpop.f32.mrb[4].mxu0 }
 0x237   :  { %v370_v49 = vadd.f32 %v1312_v47, %v1919_v44  ;;  %v361_v50 = vpop.f32.mrb[5].mxu0 }
 0x238   :  { %v362_v52 = vadd.f32 %v361_v50, %v1921_v45  ;;  %v1313_v53 = vpop.f32.mrb[6].mxu0 }
 0x239   :  { %v373_v54 = vadd.f32 %v1313_v53, %v1925_v48  ;;  %v364_v55 = vpop.f32.mrb[7].mxu0  ;;  %v378_v59 = vmax.f32 %v370_v49, 0.0 }
 0x23a   :  { %v365_v57 = vadd.f32 %v364_v55, %v1928_v51  ;;  %v376_v61 = vmax.f32 %v362_v52, 0.0  ;;  %v1476_v55 = vld [vmem:[%s2115_s9 + $0x48] sm:$0xff]  }
 0x23b   :  { %v379_v60 = vmax.f32 %v373_v54, 0.0  ;;  %v1475_v54 = vld [vmem:[%s2115_s9 + $0x40] sm:$0xff]  }
 0x23c   :  { %v377_v62 = vmax.f32 %v365_v57, 0.0  ;;  %v1479_v57 = vld [vmem:[%s2115_s9 + $0x60] sm:$0xff]  }
 0x23d   :  { %v381_v63 = vpack.c.bf16 %v379_v60, %v378_v59 }
 0x23e   :  { %v380_v1 = vpack.c.bf16 %v377_v62, %v376_v61 }
 0x240   :  { %1315 = vmatpush3.bf16.msra.mxu0 %v380_v1 }
 0x241   :  { %1316 = vmatprep.subr.bf16.mxu0 %v1672_v0 }
 0x244   :  { %1317 = vmatpush3.bf16.msra.mxu0 %v381_v63 }
 0x245   :  { %1322 = vmatprep.subr.bf16.mxu0 %v1672_v0 }
 0x247   :  { %1319 = vmatmul.mubr.msk.bf16.vlgmr.msra.gmra.mrb[8].mxu0 %vm382_vm10, %v1941_v4 }
 0x248   :  { %1323 = vmatpush3.bf16.msra.mxu0 %v1459_v5  ;;  %1338 = vmatprep.mubr.msk.bf16.mxu0 %vm1673_vm0, %v1672_v0 }
 0x249   :  { %1324 = vmatprep.subr.bf16.mxu0 %v1672_v0 }
 0x24c   :  { %1325 = vmatpush3.bf16.msra.mxu0 %v1460_v6 }
 0x24d   :  { %1326 = vmatprep.subr.bf16.mxu0 %v1672_v0 }
 0x250   :  { %1327 = vmatpush3.bf16.msra.mxu0 %v1461_v7 }
 0x251   :  { %1328 = vmatprep.subr.bf16.mxu0 %v1672_v0 }
 0x254   :  { %1329 = vmatpush3.bf16.msra.mxu0 %v1462_v8 }
 0x255   :  { %1330 = vmatprep.subr.bf16.mxu0 %v1672_v0 }
 0x258   :  { %1331 = vmatpush3.bf16.msra.mxu0 %v1463_v9 }
 0x259   :  { %1332 = vmatprep.subr.bf16.mxu0 %v1672_v0 }
 0x25c   :  { %1333 = vmatpush3.bf16.msra.mxu0 %v1464_v10 }
 0x25d   :  { %1334 = vmatprep.subr.bf16.mxu0 %v1672_v0 }
 0x260   :  { %1335 = vmatpush3.bf16.msra.mxu0 %v1465_v11  ;;  %v1486_v11 = vld [vmem:[#allocation9 + $0x58] sm:$0xff]  }
 0x261   :  { %1336 = vmatprep.subr.bf16.mxu0 %v1672_v0 }
 0x264   :  { %1337 = vmatpush3.bf16.msra.mxu0 %v1466_v12  ;;  %v1487_v12 = vld [vmem:[#allocation9 + $0x60] sm:$0xff]  }
 0x31a   :  { %v420_v19 = vpop.f32.mrb[8].mxu0 }
 0x31b   :  { %v1320_v20 = vpop.f32.mrb[9].mxu0  ;;  %v427_v22 = vadd.f32 %v420_v19, %v1904_v32 }
 0x31c   :  { %v423_v21 = vpop.f32.mrb[10].mxu0 }
 0x31d   :  { %v428_v23 = vadd.f32 %v423_v21, %v1906_v33  ;;  %v1321_v24 = vpop.f32.mrb[11].mxu0  ;;  %v1489_v21 = vld [vmem:[#allocation9 + $0x70] sm:$0xff]  }
 0x31f   :  { %v429_v26 = vpack.c.bf16 %v428_v23, %v427_v22  ;;  %v1490_v22 = vld [vmem:[#allocation9 + $0x78] sm:$0xff]  }
 0x320   :  { %v1204_v23 = vld [vmem:[#allocation7 + $0x1] ss:$0 sm:$0xff] }
 0x321   :  { %1339 = vmatmul.mubr.bf16.vlgmr.msra.gmra.mrb[12].mxu0 %v429_v26 }
 0x322   :  { %1364 = vmatprep.mubr.msk.bf16.mxu0 %vm320_vm5, %v1900_v25  ;;  %v1176_v25 = vld [vmem:[#allocation10] ss:$0 sm:$0xff] }
 0x3f4   :  { %v535_v30 = vpop.f32.mrb[12].mxu0 }
 0x3f5   :  { %v536_v31 = vadd.f32 %v1167_v29, %v535_v30  ;;  %v1340_v32 = vpop.f32.mrb[13].mxu0 }
 0x3f6   :  { %v538_v34 = vpop.f32.mrb[14].mxu0 }
 0x3f7   :  { %v539_v33 = vadd.f32 %v1167_v29, %v538_v34  ;;  %v1341_v35 = vpop.f32.mrb[15].mxu0  ;;  %v542_v36 = vmax.f32 %v536_v31, 0.0 }
 0x3f8   :  { %v1492_v35 = vld [vmem:[%s2119_s13 + $0x8] sm:$0xff]  }
 0x3f9   :  { %v543_v37 = vmax.f32 %v539_v33, 0.0  ;;  %v1491_v33 = vld [vmem:[%s2119_s13] sm:$0xff]  }
 0x3fb   :  { %v544_v39 = vpack.c.bf16 %v543_v37, %v542_v36  ;;  %v1493_v36 = vld [vmem:[%s2119_s13 + $0x10] sm:$0xff]   ;;  %v1494_v37 = vld [vmem:[%s2119_s13 + $0x18] sm:$0xff]  }
 0x3fd   :  { %1359 = vmatmul.mubr.bf16.vlgmr.msra.gmra.mrb[4].mxu1 %v544_v39  ;;  %v1495_v39 = vld [vmem:[%s2119_s13 + $0x20] sm:$0xff]  }
 0x3fe   :  { %1372 = vmatprep.mubr.msk.bf16.mxu1 %vm1673_vm0, %v1672_v0 }
 0x4d0   :  { %v650_v40 = vpop.f32.mrb[4].mxu1 }
 0x4d1   :  { %v1993_v41 = vadd.f32 %v1176_v25, %v650_v40  ;;  %v1360_v42 = vpop.f32.mrb[5].mxu1  ;;  %v1497_v40 = vld [vmem:[%s2119_s13 + $0x30] sm:$0xff]  }
 0x4d2   :  { %v653_v43 = vpop.f32.mrb[6].mxu1  ;;  %v1163_v42 = vld [vmem:[%s2110_s4] ss:$0 sm:$0xff] }
 0x4d3   :  { %v1995_v47 = vadd.f32 %v1176_v25, %v653_v43  ;;  %v1361_v49 = vpop.f32.mrb[7].mxu1  ;;  %v657_v50 = vmax.f32 %v1993_v41, 0.0  ;;  %v1496_v25 = vld [vmem:[%s2119_s13 + $0x28] sm:$0xff]   ;;  %vm316_vm11 = vcmp.eq.s32.totalorder %v1163_v42, %v1923_v46 }
 0x4d4   :  { %v1213_v41 = vld [vmem:[#allocation10 + $0x1] ss:$0 sm:$0xff] }
 0x4d5   :  { %v658_v52 = vmax.f32 %v1995_v47, 0.0 }
 0x4d7   :  { %v659_v53 = vpack.c.bf16 %v658_v52, %v657_v50 }
 0x4d9   :  { %1362 = vmatprep.subr.bf16.mxu0 %v659_v53 }
 0x4da   :  { %1363 = vmatpush3.bf16.msra.mxu0 %v659_v53 }
 0x4db   :  { %1376 = vmatprep.subr.bf16.mxu0 %v1672_v0 }
 0x4dd   :  { %1365 = vmatmul.mubr.msk.bf16.vlgmr.msra.gmra.mrb[16].mxu0 %vm320_vm5, %v1912_v38  ;;  %v1478_v38 = vld [vmem:[%s2115_s9 + $0x58] sm:$0xff]  }
 0x4de   :  { %1392 = vmatprep.mubr.msk.bf16.mxu0 %vm1673_vm0, %v1672_v0  ;;  %1377 = vmatpush3.bf16.msra.mxu0 %v1475_v54 }
 0x4df   :  { %1378 = vmatprep.subr.bf16.mxu0 %v1672_v0 }
 0x4e2   :  { %1379 = vmatpush3.bf16.msra.mxu0 %v1476_v55 }
 0x4e3   :  { %1380 = vmatprep.subr.bf16.mxu0 %v1672_v0 }
 0x4e6   :  { %1381 = vmatpush3.bf16.msra.mxu0 %v1477_v56  ;;  %v317_v56 = vsel %vm316_vm11, 1.0, %v1672_v0 }
 0x4e7   :  { %1382 = vmatprep.subr.bf16.mxu0 %v1672_v0 }
 0x4ea   :  { %1383 = vmatpush3.bf16.msra.mxu0 %v1478_v38 }
 0x4eb   :  { %1384 = vmatprep.subr.bf16.mxu0 %v1672_v0 }
 0x4ee   :  { %1385 = vmatpush3.bf16.msra.mxu0 %v1479_v57  ;;  %v318_v57 = vpack.c.bf16 %v317_v56, %v317_v56 }
 0x4ef   :  { %1386 = vmatprep.subr.bf16.mxu0 %v1672_v0 }
 0x4f2   :  { %1387 = vmatpush3.bf16.msra.mxu0 %v1480_v58  ;;  %v1498_v58 = vld [vmem:[%s2119_s13 + $0x38] sm:$0xff]  }
 0x4f3   :  { %1388 = vmatprep.subr.bf16.mxu0 %v1672_v0 }
 0x5b0   :  { %v1366_v59 = vpop.f32.mrb[16].mxu0 }
 0x5b1   :  { %v703_v60 = vadd.f32 %v1366_v59, %v1919_v44  ;;  %v694_v61 = vpop.f32.mrb[17].mxu0  ;;  %v1481_v44 = vld [vmem:[%s2115_s9 + $0x70] sm:$0xff]  }
 0x5b2   :  { %v695_v62 = vadd.f32 %v694_v61, %v1921_v45  ;;  %v1367_v63 = vpop.f32.mrb[18].mxu0  ;;  %1389 = vmatpush3.bf16.msra.mxu0 %v1481_v44  ;;  %v1482_v45 = vld [vmem:[%s2115_s9 + $0x78] sm:$0xff]  }
 0x5b3   :  { %v706_v1 = vadd.f32 %v1367_v63, %v1925_v48  ;;  %v697_v2 = vpop.f32.mrb[19].mxu0  ;;  %v711_v5 = vmax.f32 %v703_v60, 0.0  ;;  %1390 = vmatprep.subr.bf16.mxu0 %v1672_v0  ;;  %v1483_v48 = vld [vmem:[#allocation9 + $0x40] sm:$0xff]  }
 0x5b4   :  { %v698_v3 = vadd.f32 %v697_v2, %v1928_v51  ;;  %v709_v7 = vmax.f32 %v695_v62, 0.0  ;;  %v1484_v51 = vld [vmem:[#allocation9 + $0x48] sm:$0xff]   ;;  %v1223_v63 = vld [vmem:[#allocation12] ss:$0 sm:$0xff] }
 0x5b5   :  { %v712_v6 = vmax.f32 %v706_v1, 0.0 }
 0x5b6   :  { %v710_v8 = vmax.f32 %v698_v3, 0.0  ;;  %1391 = vmatpush3.bf16.msra.mxu0 %v1482_v45 }
 0x5b7   :  { %v714_v9 = vpack.c.bf16 %v712_v6, %v711_v5  ;;  %1416 = vmatprep.subr.bf16.mxu0 %v1672_v0 }
 0x5b8   :  { %v713_v10 = vpack.c.bf16 %v710_v8, %v709_v7 }
 0x5ba   :  { %1369 = vmatpush3.bf16.msra.mxu1 %v713_v10 }
 0x5bb   :  { %1370 = vmatprep.subr.bf16.mxu1 %v1672_v0 }
 0x5be   :  { %1371 = vmatpush3.bf16.msra.mxu1 %v714_v9 }
 0x5bf   :  { %1396 = vmatprep.subr.bf16.mxu1 %v1672_v0 }
 0x5c1   :  { %1373 = vmatmul.mubr.msk.bf16.vlgmr.msra.gmra.mrb[8].mxu1 %vm382_vm10, %v1941_v4  ;;  %v1485_v4 = vld [vmem:[#allocation9 + $0x50] sm:$0xff]  }
 0x5c2   :  { %1412 = vmatprep.mubr.msk.bf16.mxu1 %vm1673_vm0, %v1672_v0  ;;  %1397 = vmatpush3.bf16.msra.mxu1 %v1483_v48 }
 0x5c3   :  { %1398 = vmatprep.subr.bf16.mxu1 %v1672_v0 }
 0x5c6   :  { %1399 = vmatpush3.bf16.msra.mxu1 %v1484_v51 }
 0x5c7   :  { %1400 = vmatprep.subr.bf16.mxu1 %v1672_v0 }
 0x5ca   :  { %1401 = vmatpush3.bf16.msra.mxu1 %v1485_v4 }
 0x5cb   :  { %1402 = vmatprep.subr.bf16.mxu1 %v1672_v0 }
 0x5ce   :  { %1403 = vmatpush3.bf16.msra.mxu1 %v1486_v11 }
 0x5cf   :  { %1404 = vmatprep.subr.bf16.mxu1 %v1672_v0 }
 0x5d2   :  { %1405 = vmatpush3.bf16.msra.mxu1 %v1487_v12 }
 0x5d3   :  { %1406 = vmatprep.subr.bf16.mxu1 %v1672_v0 }
 0x5d6   :  { %1407 = vmatpush3.bf16.msra.mxu1 %v1488_v13 }
 0x5d7   :  { %1408 = vmatprep.subr.bf16.mxu1 %v1672_v0 }
 0x5da   :  { %1409 = vmatpush3.bf16.msra.mxu1 %v1489_v21 }
 0x5db   :  { %1410 = vmatprep.subr.bf16.mxu1 %v1672_v0 }
 0x5de   :  { %1411 = vmatpush3.bf16.msra.mxu1 %v1490_v22 }
 0x5df   :  { %1422 = vmatprep.subr.bf16.mxu1 %v1672_v0 }
 0x694   :  { %v749_v14 = vpop.f32.mrb[8].mxu1 }
 0x695   :  { %v1374_v15 = vpop.f32.mrb[9].mxu1  ;;  %v756_v17 = vadd.f32 %v749_v14, %v657_v50 }
 0x696   :  { %v752_v16 = vpop.f32.mrb[10].mxu1 }
 0x697   :  { %v757_v18 = vadd.f32 %v752_v16, %v658_v52  ;;  %v1375_v19 = vpop.f32.mrb[11].mxu1 }
 0x699   :  { %v758_v20 = vpack.c.bf16 %v757_v18, %v756_v17 }
 0x69b   :  { %1393 = vmatmul.mubr.bf16.vlgmr.msra.gmra.mrb[20].mxu0 %v758_v20 }
 0x69c   :  { %1418 = vmatprep.mubr.msk.bf16.mxu0 %vm1673_vm0, %v1672_v0 }
 0x76e   :  { %v866_v24 = vpop.f32.mrb[20].mxu0 }
 0x76f   :  { %v867_v26 = vadd.f32 %v1204_v23, %v866_v24  ;;  %v1394_v27 = vpop.f32.mrb[21].mxu0 }
 0x770   :  { %v869_v28 = vpop.f32.mrb[22].mxu0 }
 0x771   :  { %v870_v29 = vadd.f32 %v1204_v23, %v869_v28  ;;  %v1395_v30 = vpop.f32.mrb[23].mxu0  ;;  %v873_v31 = vmax.f32 %v867_v26, 0.0 }
 0x773   :  { %v874_v32 = vmax.f32 %v870_v29, 0.0 }
 0x775   :  { %v875_v34 = vpack.c.bf16 %v874_v32, %v873_v31 }
 0x777   :  { %1413 = vmatmul.mubr.bf16.vlgmr.msra.gmra.mrb[12].mxu1 %v875_v34 }
 0x778   :  { %1438 = vmatprep.mubr.msk.bf16.mxu1 %vm1673_vm0, %v1672_v0  ;;  %1423 = vmatpush3.bf16.msra.mxu1 %v1491_v33 }
 0x779   :  { %1424 = vmatprep.subr.bf16.mxu1 %v1672_v0 }
 0x77c   :  { %1425 = vmatpush3.bf16.msra.mxu1 %v1492_v35 }
 0x77d   :  { %1426 = vmatprep.subr.bf16.mxu1 %v1672_v0 }
 0x780   :  { %1427 = vmatpush3.bf16.msra.mxu1 %v1493_v36 }
 0x781   :  { %1428 = vmatprep.subr.bf16.mxu1 %v1672_v0 }
 0x784   :  { %1429 = vmatpush3.bf16.msra.mxu1 %v1494_v37 }
 0x785   :  { %1430 = vmatprep.subr.bf16.mxu1 %v1672_v0 }
 0x788   :  { %1431 = vmatpush3.bf16.msra.mxu1 %v1495_v39 }
 0x789   :  { %1432 = vmatprep.subr.bf16.mxu1 %v1672_v0 }
 0x78c   :  { %1433 = vmatpush3.bf16.msra.mxu1 %v1496_v25 }
 0x78d   :  { %1434 = vmatprep.subr.bf16.mxu1 %v1672_v0 }
 0x790   :  { %1435 = vmatpush3.bf16.msra.mxu1 %v1497_v40 }
 0x791   :  { %1436 = vmatprep.subr.bf16.mxu1 %v1672_v0 }
 0x794   :  { %1437 = vmatpush3.bf16.msra.mxu1 %v1498_v58 }
 0x84a   :  { %v983_v43 = vpop.f32.mrb[12].mxu1 }
 0x84b   :  { %v984_v47 = vadd.f32 %v1213_v41, %v983_v43  ;;  %v1414_v49 = vpop.f32.mrb[13].mxu1 }
 0x84c   :  { %v986_v50 = vpop.f32.mrb[14].mxu1 }
 0x84d   :  { %v987_v52 = vadd.f32 %v1213_v41, %v986_v50  ;;  %v1415_v53 = vpop.f32.mrb[15].mxu1  ;;  %v990_v54 = vmax.f32 %v984_v47, 0.0 }
 0x84f   :  { %v991_v55 = vmax.f32 %v987_v52, 0.0 }
 0x851   :  { %v992_v38 = vpack.c.bf16 %v991_v55, %v990_v54 }
 0x853   :  { %1417 = vmatpush3.bf16.msra.mxu0 %v992_v38 }
 0x856   :  { %1419 = vmatmul.mubr.msk.bf16.vlgmr.msra.gmra.mrb[24].mxu0 %vm320_vm5, %v318_v57 }
 0x929   :  { %v1030_v59 = vpop.f32.mrb[24].mxu0 }
 0x92a   :  { %v1036_v60 = vpack.c.bf16 %v1030_v59, %v1030_v59  ;;  %v1420_v61 = vpop.f32.mrb[25].mxu0 }
 0x92b   :  { %v1033_v46 = vpop.f32.mrb[26].mxu0 }
 0x92c   :  { %v1421_v62 = vpop.f32.mrb[27].mxu0  ;;  %1439 = vmatmul.mubr.bf16.vlgmr.msra.gmra.mrb[16].mxu1 %v1036_v60 }
 0x9ff   :  { %v1142_v1 = vpop.f32.mrb[16].mxu1 }
 0xa00   :  { %v1143_v2 = vadd.f32 %v1223_v63, %v1142_v1  ;;  %v1440_v0 = vpop.f32.mrb[17].mxu1 }
 0xa01   :  { %v1145_v3 = vpop.f32.mrb[18].mxu1 }
 0xa02   :  { %1148 = vst [vmem:[%s2121_s15] sm:$0xff] %v1143_v2  ;;  %v1441_v5 = vpop.f32.mrb[19].mxu1 }
 0xa03   :  { %1153 = vsyncpa [#allocation3], 1 }
 0xa04   :  { %1154 = vsyncpa [#allocation5], 1 }
 0xa05   :  { %1155 = vsyncpa [#allocation8], 1 }
 0xa06   :  { %1156 = vsyncpa [#allocation11], 1 }

</bundles_post_ra>
